<compile_context>
chip_gen: v5e
topology: v5e:2x2
jax: 0.10.0
libtpu: 0.0.40
codegen_flags: <defaults>
</compile_context>

<pallas_src>
import functools

import jax
import jax.numpy as jnp
import numpy as np
from jax import lax
from jax.experimental import pallas as pl
from jax.experimental.pallas import tpu as pltpu

MSE_WEIGHT = 0.3
LOG_MSE_WEIGHT = 0.4
CORR_WEIGHT = 0.3
EPS = 1e-8

LANE = 128
N_STATS = 7   # sum_x, sum_y, sum_x^2, sum_y^2, sum_xy, sum d^2, sum (dlog)^2


def _chunk_stats(x, y):
    """Elementwise stat contributions for one chunk (f32 in, 7 arrays out)."""
    d = x - y
    lx = jnp.log(jnp.abs(x) + EPS)
    ly = jnp.log(jnp.abs(y) + EPS)
    ld = lx - ly
    return (x, y, x * x, y * y, x * y, d * d, ld * ld)


def _stats_kernel(x_ref, y_ref, out_ref,
                  sx, sy, sxx, syy, sxy, sse, slse,
                  *, chunk, n_chunks_main, n_chunks_last, r_rem, rem_base,
                  uniform, unroll):
    """Accumulate per-(split, batch) sufficient statistics over one row tile.

    x_ref / y_ref : (tile_rows, 128) VMEM tiles of the current sample.
    out_ref       : (7, chunk, 128) per-lane raw partial sums, written once on
                    the last reduction step of this (split, batch) point.
    sx..slse      : (chunk, 128) f32 VMEM accumulators.
    """
    s = pl.program_id(0)
    j = pl.program_id(2)
    is_last_j = j == pl.num_programs(2) - 1
    # The globally last (possibly ragged) tile of this sample.
    is_global_last = jnp.logical_and(s == pl.num_programs(0) - 1, is_last_j)

    accs = (sx, sy, sxx, syy, sxy, sse, slse)

    @pl.when(j == 0)
    def _():
        z = jnp.zeros((chunk, LANE), jnp.float32)
        for a in accs:
            a[...] = z

    def chunk_body(k, carry):
        r0 = pl.multiple_of(k * chunk, chunk)
        x = x_ref[pl.ds(r0, chunk), :].astype(jnp.float32)
        y = y_ref[pl.ds(r0, chunk), :].astype(jnp.float32)
        contrib = _chunk_stats(x, y)
        return tuple(c + v for c, v in zip(carry, contrib))

    def accumulate(n_chunks):
        z = jnp.zeros((chunk, LANE), jnp.float32)
        res = lax.fori_loop(0, n_chunks, chunk_body, (z,) * N_STATS,
                            unroll=max(1, min(unroll, n_chunks)))
        for a, v in zip(accs, res):
            a[...] += v

    if uniform:
        # Every tile of every sample has the same (static) number of chunks.
        if n_chunks_last > 0:
            accumulate(n_chunks_last)
    else:
        @pl.when(jnp.logical_not(is_global_last))
        def _():
            accumulate(n_chunks_main)

        if n_chunks_last > 0:
            @pl.when(is_global_last)
            def _():
                accumulate(n_chunks_last)

    if r_rem > 0:
        # Sub-chunk row remainder of the globally last tile: one static-size
        # load, folded directly into the first r_rem sublanes of each
        # accumulator.  Runs once per sample.
        @pl.when(is_global_last)
        def _():
            x = x_ref[pl.ds(rem_base, r_rem), :].astype(jnp.float32)
            y = y_ref[pl.ds(rem_base, r_rem), :].astype(jnp.float32)
            contrib = _chunk_stats(x, y)
            rows = pl.ds(0, r_rem)
            for a, v in zip(accs, contrib):
                a[rows, :] += v

    @pl.when(is_last_j)
    def _():
        # Lane-dense, unmasked full-tile stores; cross-lane reduction happens
        # in plain JAX on a few KiB of output.
        for idx, a in enumerate(accs):
            out_ref[idx] = a[...]


def enhanced_reconstruction_loss(x, y, *, tile_rows=None):
    """Pallas forward pass of EnhancedReconstructionLoss. Returns a scalar.

    tile_rows: optional override of the number of 128-lane rows per grid step.
    """
    assert x.shape == y.shape, "x and y must have the same shape"
    b = int(x.shape[0])
    n_feat = int(np.prod(x.shape[1:]))

    xf = jnp.reshape(x, (b, n_feat))
    yf = jnp.reshape(y, (b, n_feat))

    # The packed (B, R, 128) view is a free metadata reshape when F % 128 == 0
    # (the common spectrogram/NCHW case) -> no extra HBM traffic.
    pad = (-n_feat) % LANE
    if pad:
        # TODO(synk): a <128-element feature tail still pays a wrapper-side pad
        # copy; a fully copy-free path would need a manual-DMA tail pass.
        xf = jnp.pad(xf, ((0, 0), (0, pad)))
        yf = jnp.pad(yf, ((0, 0), (0, pad)))
    r_total = (n_feat + pad) // LANE

    x3 = jnp.reshape(xf, (b, r_total, LANE))
    y3 = jnp.reshape(yf, (b, r_total, LANE))

    itemsize = x3.dtype.itemsize
    chunk = max(8, 32 // itemsize)              # full (8,128)-vreg x/y loads

    if tile_rows is None:
        tile_rows = (4 << 20) // (LANE * itemsize)   # ~4 MiB per input / step
    tile_rows = max(chunk, (int(tile_rows) // chunk) * chunk)
    if tile_rows >= r_total:
        tile_rows = r_total                     # block == full dim: always legal
    n_tiles = -(-r_total // tile_rows)

    r_last = r_total - (n_tiles - 1) * tile_rows
    n_chunks_main = max(1, tile_rows // chunk)  # non-last tiles (multi-tile only)
    n_chunks_last = r_last // chunk
    r_rem = r_last % chunk
    rem_base = n_chunks_last * chunk
    uniform = (n_tiles == 1) or (r_last == tile_rows)
    unroll = 4 if chunk == 8 else 2

    # Split the reduction range across an extra "parallel" axis when the batch
    # alone cannot keep both v7x TensorCores balanced (no-op on v5e/v6e).
    n_splits = 2 if (b % 2 == 1 and n_tiles >= 2 and n_tiles % 2 == 0) else 1
    tps = n_tiles // n_splits

    block_bytes = tile_rows * LANE * itemsize
    vmem_limit = int(min(32 << 20, max(8 << 20, 4 * block_bytes + (4 << 20))))

    kernel = functools.partial(
        _stats_kernel,
        chunk=chunk,
        n_chunks_main=n_chunks_main,
        n_chunks_last=n_chunks_last,
        r_rem=r_rem,
        rem_base=rem_base,
        uniform=uniform,
        unroll=unroll,
    )

    raw = pl.pallas_call(
        kernel,
        out_shape=jax.ShapeDtypeStruct((n_splits, b, N_STATS, chunk, LANE),
                                       jnp.float32),
        grid_spec=pltpu.PrefetchScalarGridSpec(
            num_scalar_prefetch=0,
            grid=(n_splits, b, tps),
            in_specs=[
                pl.BlockSpec((None, tile_rows, LANE),
                             lambda s, i, j: (i, s * tps + j, 0)),
                pl.BlockSpec((None, tile_rows, LANE),
                             lambda s, i, j: (i, s * tps + j, 0)),
            ],
            out_specs=pl.BlockSpec((None, None, N_STATS, chunk, LANE),
                                   lambda s, i, j: (s, i, 0, 0, 0)),
            scratch_shapes=[pltpu.VMEM((chunk, LANE), jnp.float32)] * N_STATS,
        ),
        compiler_params=pltpu.CompilerParams(
            dimension_semantics=("parallel", "parallel", "arbitrary"),
            vmem_limit_bytes=vmem_limit,
        ),
    )(x3, y3)

    # Tiny final reductions / combine in plain JAX.
    stats = jnp.sum(raw, axis=(0, 3, 4))         # (B, 7) per-batch raw sums

    sum_x = stats[:, 0]
    sum_y = stats[:, 1]
    sum_x2 = stats[:, 2]
    sum_y2 = stats[:, 3]
    sum_xy = stats[:, 4]
    sse_tot = jnp.sum(stats[:, 5])
    lsse_tot = jnp.sum(stats[:, 6])

    n_f = jnp.float32(n_feat)
    n_total = jnp.float32(n_feat * b)
    mse = sse_tot / n_total
    log_mse = lsse_tot / n_total

    # Single-pass Pearson from raw sums (clamped against tiny negative
    # variances from f32 cancellation); matches the two-pass reference for
    # roughly zero-mean spectrogram-scale inputs.
    cov = sum_xy - sum_x * sum_y / n_f
    xvar = jnp.maximum(sum_x2 - sum_x * sum_x / n_f, 0.0)
    yvar = jnp.maximum(sum_y2 - sum_y * sum_y / n_f, 0.0)
    corr = cov / (jnp.sqrt(xvar + EPS) * jnp.sqrt(yvar + EPS))
    corr_loss = 1.0 - jnp.mean(corr)

    return MSE_WEIGHT * mse + LOG_MSE_WEIGHT * log_mse + CORR_WEIGHT * corr_loss


def _reference_loss(x, y):
    """Pure-JAX reference mirroring the PyTorch module exactly."""
    x = x.astype(jnp.float32)
    y = y.astype(jnp.float32)
    mse_loss = jnp.mean((x - y) ** 2)
    log_x = jnp.log(jnp.abs(x) + EPS)
    log_y = jnp.log(jnp.abs(y) + EPS)
    log_mse_loss = jnp.mean((log_x - log_y) ** 2)
    b = x.shape[0]
    x_flat = x.reshape(b, -1)
    y_flat = y.reshape(b, -1)
    x_c = x_flat - x_flat.mean(axis=1, keepdims=True)
    y_c = y_flat - y_flat.mean(axis=1, keepdims=True)
    x_std = jnp.sqrt(jnp.sum(x_c ** 2, axis=1) + EPS)
    y_std = jnp.sqrt(jnp.sum(y_c ** 2, axis=1) + EPS)
    corr = jnp.sum(x_c * y_c, axis=1) / (x_std * y_std)
    corr_loss = 1.0 - jnp.mean(corr)
    return (MSE_WEIGHT * mse_loss
            + LOG_MSE_WEIGHT * log_mse_loss
            + CORR_WEIGHT * corr_loss)


if __name__ == "__main__":
    key = jax.random.PRNGKey(0)
    keys = jax.random.split(key, 10)

    def check(shape, noise, dtype=jnp.float32, tile_rows=None,
              rtol=1e-4, atol=1e-5, k0=0):
        xs = jax.random.normal(keys[k0], shape, dtype=jnp.float32)
        ys = xs + noise * jax.random.normal(keys[k0 + 1], shape, dtype=jnp.float32)
        xs = xs.astype(dtype)
        ys = ys.astype(dtype)
        loss = enhanced_reconstruction_loss(xs, ys, tile_rows=tile_rows)
        jax.block_until_ready(loss)
        ref = _reference_loss(xs, ys)
        np.testing.assert_allclose(np.asarray(loss), np.asarray(ref),
                                   rtol=rtol, atol=atol)

    # Base NCHW case: F = 1024 -> single packed tile, no remainder.
    check((2, 4, 16, 16), 0.1, k0=0)
    # Ragged last tile (R=24, 16-row tiles): non-uniform static chunk counts.
    check((2, 3, 32, 32), 0.2, tile_rows=16, k0=2)
    # B=1 with an even number of tiles -> exercises the 2-way reduction split.
    check((1, 4, 64, 32), 0.1, tile_rows=16, k0=4)
    # Sub-chunk sample (R=5): remainder-row path, block == full array extent.
    check((2, 5, 8, 16), 0.1, k0=6)
    # Ragged tile whose tail (R=21, tile_rows=16) is smaller than one chunk.
    check((2, 7, 3, 128), 0.15, tile_rows=16, k0=8)
    # bf16 inputs: 16-row full-vreg chunks, f32 accumulation in-kernel.
    check((2, 4, 32, 32), 0.1, dtype=jnp.bfloat16, rtol=2e-4, atol=2e-4, k0=0)

    print("KERNEL_OK")
</pallas_src>

<mosaic_0001>
module attributes {stable_mosaic.version = 11 : i64} {
  func.func @_stats_kernel(%arg0: i32, %arg1: i32, %arg2: i32, %arg3: memref<1x8x128xf32, #tpu.memory_space<vmem>>, %arg4: memref<1x8x128xf32, #tpu.memory_space<vmem>>, %arg5: memref<1x1x7x8x128xf32, #tpu.memory_space<vmem>>, %arg6: memref<8x128xf32, #tpu.memory_space<vmem>>, %arg7: memref<8x128xf32, #tpu.memory_space<vmem>>, %arg8: memref<8x128xf32, #tpu.memory_space<vmem>>, %arg9: memref<8x128xf32, #tpu.memory_space<vmem>>, %arg10: memref<8x128xf32, #tpu.memory_space<vmem>>, %arg11: memref<8x128xf32, #tpu.memory_space<vmem>>, %arg12: memref<8x128xf32, #tpu.memory_space<vmem>>) attributes {dimension_semantics = [#tpu.dimension_semantics<parallel>, #tpu.dimension_semantics<parallel>, #tpu.dimension_semantics<arbitrary>], iteration_bounds = array<i64: 1, 2, 1>, scalar_prefetch = 0 : i64, scratch_operands = 7 : i64, tpu.core_type = #tpu.core_type<tc>, window_params = [{transform_indices = @transform_0, window_bounds = array<i64: 1, 8, 128>}, {transform_indices = @transform_1, window_bounds = array<i64: 1, 8, 128>}, {transform_indices = @transform_2, window_bounds = array<i64: 1, 1, 7, 8, 128>}]} {
    %c0_i32 = arith.constant 0 : i32
    %0 = arith.cmpi eq, %arg2, %c0_i32 : i32
    %c0_i32_0 = arith.constant 0 : i32
    %1 = arith.cmpi eq, %arg2, %c0_i32_0 : i32
    %2 = arith.extui %1 : i1 to i32
    %c0_i32_1 = arith.constant 0 : i32
    %3 = arith.cmpi ne, %2, %c0_i32_1 : i32
    scf.if %3 {
      %cst_37 = arith.constant 0.000000e+00 : f32
      %58 = vector.broadcast %cst_37 : f32 to vector<8x128xf32>
      %c0_38 = arith.constant 0 : index
      %c0_39 = arith.constant 0 : index
      %59 = vector.load %arg6[%c0_38, %c0_39] : memref<8x128xf32, #tpu.memory_space<vmem>>, vector<8x128xf32>
      tpu.vector_store %arg6[%c0_38, %c0_39], %58 {strides = array<i32>} : memref<8x128xf32, #tpu.memory_space<vmem>>, vector<8x128xf32>,
      %c0_40 = arith.constant 0 : index
      %c0_41 = arith.constant 0 : index
      %60 = vector.load %arg7[%c0_40, %c0_41] : memref<8x128xf32, #tpu.memory_space<vmem>>, vector<8x128xf32>
      tpu.vector_store %arg7[%c0_40, %c0_41], %58 {strides = array<i32>} : memref<8x128xf32, #tpu.memory_space<vmem>>, vector<8x128xf32>,
      %c0_42 = arith.constant 0 : index
      %c0_43 = arith.constant 0 : index
      %61 = vector.load %arg8[%c0_42, %c0_43] : memref<8x128xf32, #tpu.memory_space<vmem>>, vector<8x128xf32>
      tpu.vector_store %arg8[%c0_42, %c0_43], %58 {strides = array<i32>} : memref<8x128xf32, #tpu.memory_space<vmem>>, vector<8x128xf32>,
      %c0_44 = arith.constant 0 : index
      %c0_45 = arith.constant 0 : index
      %62 = vector.load %arg9[%c0_44, %c0_45] : memref<8x128xf32, #tpu.memory_space<vmem>>, vector<8x128xf32>
      tpu.vector_store %arg9[%c0_44, %c0_45], %58 {strides = array<i32>} : memref<8x128xf32, #tpu.memory_space<vmem>>, vector<8x128xf32>,
      %c0_46 = arith.constant 0 : index
      %c0_47 = arith.constant 0 : index
      %63 = vector.load %arg10[%c0_46, %c0_47] : memref<8x128xf32, #tpu.memory_space<vmem>>, vector<8x128xf32>
      tpu.vector_store %arg10[%c0_46, %c0_47], %58 {strides = array<i32>} : memref<8x128xf32, #tpu.memory_space<vmem>>, vector<8x128xf32>,
      %c0_48 = arith.constant 0 : index
      %c0_49 = arith.constant 0 : index
      %64 = vector.load %arg11[%c0_48, %c0_49] : memref<8x128xf32, #tpu.memory_space<vmem>>, vector<8x128xf32>
      tpu.vector_store %arg11[%c0_48, %c0_49], %58 {strides = array<i32>} : memref<8x128xf32, #tpu.memory_space<vmem>>, vector<8x128xf32>,
      %c0_50 = arith.constant 0 : index
      %c0_51 = arith.constant 0 : index
      %65 = vector.load %arg12[%c0_50, %c0_51] : memref<8x128xf32, #tpu.memory_space<vmem>>, vector<8x128xf32>
      tpu.vector_store %arg12[%c0_50, %c0_51], %58 {strides = array<i32>} : memref<8x128xf32, #tpu.memory_space<vmem>>, vector<8x128xf32>,
    } else {
    }
    %cst = arith.constant 0.000000e+00 : f32
    %4 = vector.broadcast %cst : f32 to vector<8x128xf32>
    %c0_i32_2 = arith.constant 0 : i32
    %c8_i32 = arith.constant 8 : i32
    %5 = arith.muli %c0_i32_2, %c8_i32 : i32
    %6 = tpu.assume_multiple %5, 8 : i32
    %c0 = arith.constant 0 : index
    %7 = arith.index_cast %6 : i32 to index
    %c0_3 = arith.constant 0 : index
    %8 = vector.load %arg3[%c0, %7, %c0_3] : memref<1x8x128xf32, #tpu.memory_space<vmem>>, vector<1x8x128xf32>
    %9 = vector.shape_cast %8 : vector<1x8x128xf32> to vector<8x128xf32>
    %c0_4 = arith.constant 0 : index
    %10 = arith.index_cast %6 : i32 to index
    %c0_5 = arith.constant 0 : index
    %11 = vector.load %arg4[%c0_4, %10, %c0_5] : memref<1x8x128xf32, #tpu.memory_space<vmem>>, vector<1x8x128xf32>
    %12 = vector.shape_cast %11 : vector<1x8x128xf32> to vector<8x128xf32>
    %13 = arith.subf %9, %12 : vector<8x128xf32>
    %14 = math.absf %9 : vector<8x128xf32>
    %cst_6 = arith.constant 9.99999993E-9 : f32
    %15 = vector.broadcast %cst_6 : f32 to vector<8x128xf32>
    %16 = arith.addf %14, %15 : vector<8x128xf32>
    %17 = math.log %16 : vector<8x128xf32>
    %18 = math.absf %12 : vector<8x128xf32>
    %cst_7 = arith.constant 9.99999993E-9 : f32
    %19 = vector.broadcast %cst_7 : f32 to vector<8x128xf32>
    %20 = arith.addf %18, %19 : vector<8x128xf32>
    %21 = math.log %20 : vector<8x128xf32>
    %22 = arith.subf %17, %21 : vector<8x128xf32>
    %23 = arith.mulf %9, %9 : vector<8x128xf32>
    %24 = arith.mulf %12, %12 : vector<8x128xf32>
    %25 = arith.mulf %9, %12 : vector<8x128xf32>
    %26 = arith.mulf %13, %13 : vector<8x128xf32>
    %27 = arith.mulf %22, %22 : vector<8x128xf32>
    %28 = arith.addf %4, %9 : vector<8x128xf32>
    %29 = arith.addf %4, %12 : vector<8x128xf32>
    %30 = arith.addf %4, %23 : vector<8x128xf32>
    %31 = arith.addf %4, %24 : vector<8x128xf32>
    %32 = arith.addf %4, %25 : vector<8x128xf32>
    %33 = arith.addf %4, %26 : vector<8x128xf32>
    %34 = arith.addf %4, %27 : vector<8x128xf32>
    %c1_i32 = arith.constant 1 : i32
    %c0_8 = arith.constant 0 : index
    %c0_9 = arith.constant 0 : index
    %35 = vector.load %arg6[%c0_8, %c0_9] : memref<8x128xf32, #tpu.memory_space<vmem>>, vector<8x128xf32>
    %36 = arith.addf %35, %28 : vector<8x128xf32>
    %c0_10 = arith.constant 0 : index
    %c0_11 = arith.constant 0 : index
    %37 = vector.load %arg6[%c0_10, %c0_11] : memref<8x128xf32, #tpu.memory_space<vmem>>, vector<8x128xf32>
    tpu.vector_store %arg6[%c0_10, %c0_11], %36 {strides = array<i32>} : memref<8x128xf32, #tpu.memory_space<vmem>>, vector<8x128xf32>,
    %c0_12 = arith.constant 0 : index
    %c0_13 = arith.constant 0 : index
    %38 = vector.load %arg7[%c0_12, %c0_13] : memref<8x128xf32, #tpu.memory_space<vmem>>, vector<8x128xf32>
    %39 = arith.addf %38, %29 : vector<8x128xf32>
    %c0_14 = arith.constant 0 : index
    %c0_15 = arith.constant 0 : index
    %40 = vector.load %arg7[%c0_14, %c0_15] : memref<8x128xf32, #tpu.memory_space<vmem>>, vector<8x128xf32>
    tpu.vector_store %arg7[%c0_14, %c0_15], %39 {strides = array<i32>} : memref<8x128xf32, #tpu.memory_space<vmem>>, vector<8x128xf32>,
    %c0_16 = arith.constant 0 : index
    %c0_17 = arith.constant 0 : index
    %41 = vector.load %arg8[%c0_16, %c0_17] : memref<8x128xf32, #tpu.memory_space<vmem>>, vector<8x128xf32>
    %42 = arith.addf %41, %30 : vector<8x128xf32>
    %c0_18 = arith.constant 0 : index
    %c0_19 = arith.constant 0 : index
    %43 = vector.load %arg8[%c0_18, %c0_19] : memref<8x128xf32, #tpu.memory_space<vmem>>, vector<8x128xf32>
    tpu.vector_store %arg8[%c0_18, %c0_19], %42 {strides = array<i32>} : memref<8x128xf32, #tpu.memory_space<vmem>>, vector<8x128xf32>,
    %c0_20 = arith.constant 0 : index
    %c0_21 = arith.constant 0 : index
    %44 = vector.load %arg9[%c0_20, %c0_21] : memref<8x128xf32, #tpu.memory_space<vmem>>, vector<8x128xf32>
    %45 = arith.addf %44, %31 : vector<8x128xf32>
    %c0_22 = arith.constant 0 : index
    %c0_23 = arith.constant 0 : index
    %46 = vector.load %arg9[%c0_22, %c0_23] : memref<8x128xf32, #tpu.memory_space<vmem>>, vector<8x128xf32>
    tpu.vector_store %arg9[%c0_22, %c0_23], %45 {strides = array<i32>} : memref<8x128xf32, #tpu.memory_space<vmem>>, vector<8x128xf32>,
    %c0_24 = arith.constant 0 : index
    %c0_25 = arith.constant 0 : index
    %47 = vector.load %arg10[%c0_24, %c0_25] : memref<8x128xf32, #tpu.memory_space<vmem>>, vector<8x128xf32>
    %48 = arith.addf %47, %32 : vector<8x128xf32>
    %c0_26 = arith.constant 0 : index
    %c0_27 = arith.constant 0 : index
    %49 = vector.load %arg10[%c0_26, %c0_27] : memref<8x128xf32, #tpu.memory_space<vmem>>, vector<8x128xf32>
    tpu.vector_store %arg10[%c0_26, %c0_27], %48 {strides = array<i32>} : memref<8x128xf32, #tpu.memory_space<vmem>>, vector<8x128xf32>,
    %c0_28 = arith.constant 0 : index
    %c0_29 = arith.constant 0 : index
    %50 = vector.load %arg11[%c0_28, %c0_29] : memref<8x128xf32, #tpu.memory_space<vmem>>, vector<8x128xf32>
    %51 = arith.addf %50, %33 : vector<8x128xf32>
    %c0_30 = arith.constant 0 : index
    %c0_31 = arith.constant 0 : index
    %52 = vector.load %arg11[%c0_30, %c0_31] : memref<8x128xf32, #tpu.memory_space<vmem>>, vector<8x128xf32>
    tpu.vector_store %arg11[%c0_30, %c0_31], %51 {strides = array<i32>} : memref<8x128xf32, #tpu.memory_space<vmem>>, vector<8x128xf32>,
    %c0_32 = arith.constant 0 : index
    %c0_33 = arith.constant 0 : index
    %53 = vector.load %arg12[%c0_32, %c0_33] : memref<8x128xf32, #tpu.memory_space<vmem>>, vector<8x128xf32>
    %54 = arith.addf %53, %34 : vector<8x128xf32>
    %c0_34 = arith.constant 0 : index
    %c0_35 = arith.constant 0 : index
    %55 = vector.load %arg12[%c0_34, %c0_35] : memref<8x128xf32, #tpu.memory_space<vmem>>, vector<8x128xf32>
    tpu.vector_store %arg12[%c0_34, %c0_35], %54 {strides = array<i32>} : memref<8x128xf32, #tpu.memory_space<vmem>>, vector<8x128xf32>,
    %56 = arith.extui %0 : i1 to i32
    %c0_i32_36 = arith.constant 0 : i32
    %57 = arith.cmpi ne, %56, %c0_i32_36 : i32
    scf.if %57 {
      %c0_37 = arith.constant 0 : index
      %c0_38 = arith.constant 0 : index
      %58 = vector.load %arg6[%c0_37, %c0_38] : memref<8x128xf32, #tpu.memory_space<vmem>>, vector<8x128xf32>
      %c0_39 = arith.constant 0 : index
      %c0_40 = arith.constant 0 : index
      %c0_41 = arith.constant 0 : index
      %c0_42 = arith.constant 0 : index
      %c0_43 = arith.constant 0 : index
      %59 = vector.load %arg5[%c0_39, %c0_40, %c0_41, %c0_42, %c0_43] : memref<1x1x7x8x128xf32, #tpu.memory_space<vmem>>, vector<1x1x1x8x128xf32>
      %60 = vector.shape_cast %59 : vector<1x1x1x8x128xf32> to vector<8x128xf32>
      %61 = vector.shape_cast %58 : vector<8x128xf32> to vector<1x1x1x8x128xf32>
      tpu.vector_store %arg5[%c0_39, %c0_40, %c0_41, %c0_42, %c0_43], %61 {strides = array<i32>} : memref<1x1x7x8x128xf32, #tpu.memory_space<vmem>>, vector<1x1x1x8x128xf32>,
      %c0_44 = arith.constant 0 : index
      %c0_45 = arith.constant 0 : index
      %62 = vector.load %arg7[%c0_44, %c0_45] : memref<8x128xf32, #tpu.memory_space<vmem>>, vector<8x128xf32>
      %c0_46 = arith.constant 0 : index
      %c0_47 = arith.constant 0 : index
      %c1 = arith.constant 1 : index
      %c0_48 = arith.constant 0 : index
      %c0_49 = arith.constant 0 : index
      %63 = vector.load %arg5[%c0_46, %c0_47, %c1, %c0_48, %c0_49] : memref<1x1x7x8x128xf32, #tpu.memory_space<vmem>>, vector<1x1x1x8x128xf32>
      %64 = vector.shape_cast %63 : vector<1x1x1x8x128xf32> to vector<8x128xf32>
      %65 = vector.shape_cast %62 : vector<8x128xf32> to vector<1x1x1x8x128xf32>
      tpu.vector_store %arg5[%c0_46, %c0_47, %c1, %c0_48, %c0_49], %65 {strides = array<i32>} : memref<1x1x7x8x128xf32, #tpu.memory_space<vmem>>, vector<1x1x1x8x128xf32>,
      %c0_50 = arith.constant 0 : index
      %c0_51 = arith.constant 0 : index
      %66 = vector.load %arg8[%c0_50, %c0_51] : memref<8x128xf32, #tpu.memory_space<vmem>>, vector<8x128xf32>
      %c0_52 = arith.constant 0 : index
      %c0_53 = arith.constant 0 : index
      %c2 = arith.constant 2 : index
      %c0_54 = arith.constant 0 : index
      %c0_55 = arith.constant 0 : index
      %67 = vector.load %arg5[%c0_52, %c0_53, %c2, %c0_54, %c0_55] : memref<1x1x7x8x128xf32, #tpu.memory_space<vmem>>, vector<1x1x1x8x128xf32>
      %68 = vector.shape_cast %67 : vector<1x1x1x8x128xf32> to vector<8x128xf32>
      %69 = vector.shape_cast %66 : vector<8x128xf32> to vector<1x1x1x8x128xf32>
      tpu.vector_store %arg5[%c0_52, %c0_53, %c2, %c0_54, %c0_55], %69 {strides = array<i32>} : memref<1x1x7x8x128xf32, #tpu.memory_space<vmem>>, vector<1x1x1x8x128xf32>,
      %c0_56 = arith.constant 0 : index
      %c0_57 = arith.constant 0 : index
      %70 = vector.load %arg9[%c0_56, %c0_57] : memref<8x128xf32, #tpu.memory_space<vmem>>, vector<8x128xf32>
      %c0_58 = arith.constant 0 : index
      %c0_59 = arith.constant 0 : index
      %c3 = arith.constant 3 : index
      %c0_60 = arith.constant 0 : index
      %c0_61 = arith.constant 0 : index
      %71 = vector.load %arg5[%c0_58, %c0_59, %c3, %c0_60, %c0_61] : memref<1x1x7x8x128xf32, #tpu.memory_space<vmem>>, vector<1x1x1x8x128xf32>
      %72 = vector.shape_cast %71 : vector<1x1x1x8x128xf32> to vector<8x128xf32>
      %73 = vector.shape_cast %70 : vector<8x128xf32> to vector<1x1x1x8x128xf32>
      tpu.vector_store %arg5[%c0_58, %c0_59, %c3, %c0_60, %c0_61], %73 {strides = array<i32>} : memref<1x1x7x8x128xf32, #tpu.memory_space<vmem>>, vector<1x1x1x8x128xf32>,
      %c0_62 = arith.constant 0 : index
      %c0_63 = arith.constant 0 : index
      %74 = vector.load %arg10[%c0_62, %c0_63] : memref<8x128xf32, #tpu.memory_space<vmem>>, vector<8x128xf32>
      %c0_64 = arith.constant 0 : index
      %c0_65 = arith.constant 0 : index
      %c4 = arith.constant 4 : index
      %c0_66 = arith.constant 0 : index
      %c0_67 = arith.constant 0 : index
      %75 = vector.load %arg5[%c0_64, %c0_65, %c4, %c0_66, %c0_67] : memref<1x1x7x8x128xf32, #tpu.memory_space<vmem>>, vector<1x1x1x8x128xf32>
      %76 = vector.shape_cast %75 : vector<1x1x1x8x128xf32> to vector<8x128xf32>
      %77 = vector.shape_cast %74 : vector<8x128xf32> to vector<1x1x1x8x128xf32>
      tpu.vector_store %arg5[%c0_64, %c0_65, %c4, %c0_66, %c0_67], %77 {strides = array<i32>} : memref<1x1x7x8x128xf32, #tpu.memory_space<vmem>>, vector<1x1x1x8x128xf32>,
      %c0_68 = arith.constant 0 : index
      %c0_69 = arith.constant 0 : index
      %78 = vector.load %arg11[%c0_68, %c0_69] : memref<8x128xf32, #tpu.memory_space<vmem>>, vector<8x128xf32>
      %c0_70 = arith.constant 0 : index
      %c0_71 = arith.constant 0 : index
      %c5 = arith.constant 5 : index
      %c0_72 = arith.constant 0 : index
      %c0_73 = arith.constant 0 : index
      %79 = vector.load %arg5[%c0_70, %c0_71, %c5, %c0_72, %c0_73] : memref<1x1x7x8x128xf32, #tpu.memory_space<vmem>>, vector<1x1x1x8x128xf32>
      %80 = vector.shape_cast %79 : vector<1x1x1x8x128xf32> to vector<8x128xf32>
      %81 = vector.shape_cast %78 : vector<8x128xf32> to vector<1x1x1x8x128xf32>
      tpu.vector_store %arg5[%c0_70, %c0_71, %c5, %c0_72, %c0_73], %81 {strides = array<i32>} : memref<1x1x7x8x128xf32, #tpu.memory_space<vmem>>, vector<1x1x1x8x128xf32>,
      %c0_74 = arith.constant 0 : index
      %c0_75 = arith.constant 0 : index
      %82 = vector.load %arg12[%c0_74, %c0_75] : memref<8x128xf32, #tpu.memory_space<vmem>>, vector<8x128xf32>
      %c0_76 = arith.constant 0 : index
      %c0_77 = arith.constant 0 : index
      %c6 = arith.constant 6 : index
      %c0_78 = arith.constant 0 : index
      %c0_79 = arith.constant 0 : index
      %83 = vector.load %arg5[%c0_76, %c0_77, %c6, %c0_78, %c0_79] : memref<1x1x7x8x128xf32, #tpu.memory_space<vmem>>, vector<1x1x1x8x128xf32>
      %84 = vector.shape_cast %83 : vector<1x1x1x8x128xf32> to vector<8x128xf32>
      %85 = vector.shape_cast %82 : vector<8x128xf32> to vector<1x1x1x8x128xf32>
      tpu.vector_store %arg5[%c0_76, %c0_77, %c6, %c0_78, %c0_79], %85 {strides = array<i32>} : memref<1x1x7x8x128xf32, #tpu.memory_space<vmem>>, vector<1x1x1x8x128xf32>,
    } else {
    }
    return
  }
  func.func @transform_0(%arg0: i32, %arg1: i32, %arg2: i32) -> (i32, i32, i32) {
    %c1_i32 = arith.constant 1 : i32
    %0 = arith.muli %arg0, %c1_i32 : i32
    %1 = arith.addi %0, %arg2 : i32
    %c0_i32 = arith.constant 0 : i32
    %c0_i32_0 = arith.constant 0 : i32
    return %arg1, %1, %c0_i32 : i32, i32, i32
  }
  func.func @transform_1(%arg0: i32, %arg1: i32, %arg2: i32) -> (i32, i32, i32) {
    %c1_i32 = arith.constant 1 : i32
    %0 = arith.muli %arg0, %c1_i32 : i32
    %1 = arith.addi %0, %arg2 : i32
    %c0_i32 = arith.constant 0 : i32
    %c0_i32_0 = arith.constant 0 : i32
    return %arg1, %1, %c0_i32 : i32, i32, i32
  }
  func.func @transform_2(%arg0: i32, %arg1: i32, %arg2: i32) -> (i32, i32, i32, i32, i32) {
    %c0_i32 = arith.constant 0 : i32
    %c0_i32_0 = arith.constant 0 : i32
    %c0_i32_1 = arith.constant 0 : i32
    %c0_i32_2 = arith.constant 0 : i32
    return %arg0, %arg1, %c0_i32, %c0_i32_0, %c0_i32_1 : i32, i32, i32, i32, i32
  }
}

</mosaic_0001>

<bundles_post_ra>
// kernel: tpu_custom_call.1
= control target key start
LH: loop header
LB: loop body
LE: loop exit
PB: predicated region body
PF: predicated region fallthrough
CT: control target
= control target key end

     0   :  { %7 = vsyncpa [#allocation10], 0  ;;  %s845_s0 = inlined_call_operand.hbm [shape: f32[2,8,128], index: 0, kind: input, shape index: {}]   ;;  %s846_s1 = inlined_call_operand.hbm [shape: f32[2,8,128], index: 1, kind: input, shape index: {}]   ;;  %s847_s2 = inlined_call_operand.hbm [shape: f32[1,2,7,8,128], index: 2, kind: output, shape index: {}]  }
   0x1   :  { %9 = vsyncpa [#allocation10 + $0x1], 0 }
   0x2   :  { %10 = vsyncpa [#allocation13], 0 }
   0x3   :  { %12 = vsyncpa [#allocation13 + $0x1], 0 }
   0x4   :  { %13 = vsyncpa [#allocation11], 0 }
   0x5   :  { %15 = vsyncpa [#allocation11 + $0x1], 0  ;;  %s706_s9 = smov 0   ;;  %s708_s10 = smov 0  }
   0x6   :  { %s710_s11 = smov 0   ;;  %s712_s12 = smov 0  }
   0x7   :  { %s714_s13 = smov 0   ;;  %s716_s14 = smov 0  }
   0x8 LB: > { %s446_s15 = sadd.s32 4294967295, %s687_s14   ;;  %s447_s16 = sadd.s32 4294967294, %s687_s14   ;;  %s687_s14 = sphi %s716_s14, %s21_s14   ;;  %s683_s13 = sphi %s714_s13, %s856_s13   ;;  %s679_s12 = sphi %s712_s12, %s855_s12   ;;  %s675_s11 = sphi %s710_s11, %s854_s11   ;;  %s671_s10 = sphi %s708_s10, %s853_s10   ;;  %s667_s9 = sphi %s706_s9, %s852_s9  }
   0x9   : > { %s36_s17 = sadd.s32 1, %s683_s13  ;;  %s51_s18 = sadd.s32 1, %s675_s11 }
   0xa   : > { %p38_p0 = scmp.ge.s32.totalorder %s36_s17, 2  ;;  %p58_p1 = scmp.ne.s32.totalorder %s675_s11, %s671_s10 }
   0xb   : > { %p59_p2 = scmp.eq.s32.totalorder %s687_s14, 0  ;;  %p64_p3 = scmp.ne.s32.totalorder %s671_s10, %s667_s9 }
   0xc   : > { %s858_s17 = smov (%p38_p0, %s36_s17), 0  ;;  %p65_p5 = scmp.eq.s32.totalorder %s446_s15, 0 }
   0xd   : > { %p747_p4 = por %p59_p2, %p58_p1  ;;  %s46_s20 = ssub.s32 %s683_s13, %s858_s17 }
   0xe   : > { %p120_p6 = scmp.eq.s32.totalorder %s446_s15, 1  ;;  %p49_p7 = scmp.eq.s32.totalorder %s46_s20, 0 }
   0xf   : > { %p753_p8 = por %p65_p5, %p64_p3  ;;  %p126_p10 = scmp.eq.s32.totalorder %s447_s16, 1 }
  0x10   : > { %p757_p9 = por %p120_p6, %p58_p1  ;;  %p449_p12 = scmp.ge.s32.totalorder %s687_s14, 2 }
  0x11   : > { %s762_s23 = scalar_select %p49_p7, %s675_s11, %s51_s18  }
  0x12   : > { %p764_p11 = por %p126_p10, %p64_p3  ;;  %p485_p13 = scmp.lt.s32.totalorder %s687_s14, 2 }
  0x13   : > { %s146_s25 = sand.u32 1, %s675_s11   ;;  %s451_s27 = sshll.u32 %s683_s13, 3 }
  0x14   : > { %s450_s26 = sshll.u32 %s146_s25, 3  ;;  %s156_s30 = scalar_lea.hbm %s845_s0, %s451_s27 }
  0x15   : > { %s150_s3 = scalar_lea.vmem [#allocation9], %s450_s26  ;;  %s158_s5 = sshll.u32 %s156_s30, 4  ;;  %s159_s5 = int_to_ptr.hbm [resolvable:$true] %s158_s5 }
  0x16   : > { %s160_s4 = sshll.u32 %s150_s3, 4  ;;  %p475_p0 = pnand %p485_p13, %p747_p4  ;;  %s161_s4 = int_to_ptr.vmem [resolvable:$true] %s160_s4 }
  0x17   : > { %p454_p1 = scmp.ge.s32.totalorder %s687_s14, 1  ;;  %p186_p2 = scmp.lt.s32.totalorder %s687_s14, 3 }
  0x18   : > { %s147_s6 = scalar_lea.sflag [#allocation10], %s146_s25  ;;  %s177_s15 = scalar_lea.hbm %s846_s1, %s451_s27 }
  0x19   : > { %477 = dma.hbm_to_vmem [thread:$0]  (!%p475_p0), %s159_s5, 128, %s161_s4, %s147_s6  }
  0x1a   : > { %p187_p3 = pnand %p454_p1, %p186_p2  ;;  %s171_s16 = scalar_lea.vmem [#allocation12], %s450_s26 }
  0x1b   : > { %s181_s18 = sshll.u32 %s171_s16, 4  ;;  %s179_s20 = sshll.u32 %s177_s15, 4  ;;  %s182_s18 = int_to_ptr.vmem [resolvable:$true] %s181_s18  ;;  %s180_s20 = int_to_ptr.hbm [resolvable:$true] %s179_s20 }
  0x1c   : > { %s168_s28 = scalar_lea.sflag [#allocation13], %s146_s25  ;;  %190 = sbr.rel (%p187_p3) target bundleno = 60 (0x3c), region = 28 }
  0x1d   : > { %480 = dma.hbm_to_vmem [thread:$0]  (!%p475_p0), %s180_s20, 128, %s182_s18, %s168_s28  }
  0x1e   : > { %s783_s19 = sand.u32 (!%p187_p3), 1, %s671_s10  }
  0x1f   : > { %s455_s29 = sshll.u32 (!%p187_p3), %s783_s19, 3  ;;  %s193_s30 = scalar_lea.sflag (!%p187_p3), [#allocation10], %s783_s19 }
  0x20   : > { %s196_s3 = scalar_lea.vmem (!%p187_p3), [#allocation9], %s455_s29 }
  0x21   : > { %654 = dma.done.wait (%p753_p8), %s193_s30, 128  }
  0x22   : > { %656 = vsyncadd (%p753_p8), %s193_s30, 4294967168  ;;  %s203_s26 = scalar_lea.sflag [#allocation13], %s783_s19  ;;  %s206_s25 = scalar_lea.vmem [#allocation12], %s455_s29 }
  0x23   : > { %658 = dma.done.wait (%p753_p8), %s203_s26, 128  }
  0x24   : > { %660 = vsyncadd (%p753_p8), %s203_s26, 4294967168  ;;  %s466_s27 = smul.u32 56, %s783_s19  ;;  %v246_v0 = vld [vmem:[%s196_s3] sm:$0xff]  ;;  %v247_v1 = vld [vmem:[%s206_s25] sm:$0xff]  ;;  %s315_s16 = scalar_lea.sflag [#allocation11], %s783_s19 }
  0x25   : > { %v258_v2 = vmul.f32 %v246_v0, %v246_v0  ;;  %v259_v3 = vmul.f32 %v247_v1, %v247_v1  ;;  %v260_v4 = vmul.f32 %v247_v1, %v246_v0  ;;  %v248_v5 = vsub.f32 %v246_v0, %v247_v1  ;;  %s467_s21 = smul.u32 56, %s679_s12  ;;  %s621_s29 = scalar_lea.hbm %s847_s2, 112 }
  0x26   : > { %s797_s4 = scalar_lea.vmem [#allocation14], %s466_s27  ;;  %v249_v6 = vand.u32 2147483647, %v246_v0  ;;  %v253_v7 = vand.u32 2147483647, %v247_v1 }
  0x27   : > { %295 = vst [vmem:[%s797_s4] sm:$0xff] %v246_v0  ;;  %v261_v8 = vmul.f32 %v248_v5, %v248_v5  ;;  %s328_s7 = scalar_lea.hbm %s847_s2, %s467_s21  ;;  %s329_s8 = sshll.u32 %s797_s4, 4  ;;  %s330_s8 = int_to_ptr.vmem [resolvable:$true] %s329_s8 }
  0x28   : > { %457 = vst [vmem:[%s797_s4 + $0x8] sm:$0xff] %v247_v1  ;;  %v250_v9 = vadd.f32 1e-08, %v249_v6  ;;  %v254_v10 = vadd.f32 1e-08, %v253_v7  ;;  %s331_s15 = sshll.u32 %s328_s7, 4  ;;  %s332_s15 = int_to_ptr.hbm [resolvable:$true] %s331_s15 }
  0x29   : > { %458 = vst [vmem:[%s797_s4 + $0x10] sm:$0xff] %v258_v2  ;;  %s615_s18 = sshra.s32 %s332_s15, 4  ;;  %s616_s18 = int_to_ptr.hbm [resolvable:$true] %s615_s18 }
  0x2a   : > { %459 = vst [vmem:[%s797_s4 + $0x18] sm:$0xff] %v259_v3  ;;  %537 = vlog2.f32 %v250_v9  ;;  %s617_s12 = scalar_lea.hbm %s616_s18, 56  ;;  %p622_p7 = scmp.lt.s32.totalorder %s616_s18, %s847_s2 }
  0x2b   : > { %460 = vst [vmem:[%s797_s4 + $0x20] sm:$0xff] %v260_v4  ;;  %539 = vlog2.f32 %v254_v10  ;;  %p618_p4 = scmp.ne.s32.totalorder %s616_s18, %s617_s12  ;;  %p623_p8 = scmp.lt.s32.totalorder %s621_s29, %s617_s12 }
  0x2c   : > { %461 = vst [vmem:[%s797_s4 + $0x28] sm:$0xff] %v261_v8 }
  0x2d   : > { %p619_p5 = pnand %p618_p4, %p757_p9  ;;  %p624_p10 = por %p623_p8, %p622_p7 }
  0x2f   : > { %p620_p6 = pneg %p619_p5 }
  0x30   : > { %v538_v11 = vpop.eup %537 }
  0x31   : > { %v540_v12 = vpop.eup %539  ;;  %v252_v13 = vmul.f32 0.6931472, %v538_v11  ;;  %p625_p13 = pnand %p624_p10, %p620_p6 }
  0x32   : > { %v256_v14 = vmul.f32 0.6931472, %v540_v12 }
  0x34   : > { %v257_v15 = vsub.f32 %v252_v13, %v256_v14 }
  0x36   : > { %v262_v16 = vmul.f32 %v257_v15, %v257_v15 }
  0x38   : > { %462 = vst [vmem:[%s797_s4 + $0x30] sm:$0xff] %v262_v16 }
  0x39   : > { %628 = shalt.err (!%p625_p13)
}
  0x3a   : > { %s689_s19 = smov 128   ;;  %s690_s26 = smov 8  }
  0x3b   : > { %472 = dma.vmem_to_hbm [thread:$0]  (%p757_p9), %s330_s8, 896, %s332_s15, %s315_s16, %s689_s19, %s689_s19, %s690_s26  }
  0x3c PF: > { %s346_s25 = sand.u32 1, %s667_s9   ;;  %p482_p0 = pnand %p449_p12, %p764_p11 }
  0x3d   : > { %s347_s27 = scalar_lea.sflag [#allocation11], %s346_s25 }
  0x3e   : > { %p483_p1 = pneg %p482_p0 }
  0x40   : > { %662 = dma.done.wait (%p483_p1), %s347_s27, 896  }
  0x41   : > { %664 = vsyncadd (%p483_p1), %s347_s27, 4294966400  ;;  %s21_s14 = sadd.s32 1, %s687_s14   ;;  %s852_s9 = smov %s671_s10 }
  0x42   : > { %p18_p2 = scmp.ge.s32.totalorder %s21_s14, 4   ;;  %s853_s10 = smov %s675_s11 }
  0x43   : > { %s854_s11 = smov %s762_s23  ;;  %s855_s12 = smov %s683_s13 }
  0x44   : > { %s856_s13 = smov %s858_s17  ;;  %20 = sbr.rel (!%p18_p2) target bundleno = 8 (0x8), region = 100 }
  0x49   :  { %353 = vsyncpa [#allocation10], 1 }
  0x4a   :  { %355 = vsyncpa [#allocation10 + $0x1], 1 }
  0x4b   :  { %356 = vsyncpa [#allocation13], 1 }
  0x4c   :  { %358 = vsyncpa [#allocation13 + $0x1], 1 }
  0x4d   :  { %359 = vsyncpa [#allocation11], 1 }
  0x4e   :  { %361 = vsyncpa [#allocation11 + $0x1], 1 }

</bundles_post_ra>
